<compile_context>
chip_gen: v7x
topology: tpu7x:2x2x1
jax: 0.10.0
libtpu: 0.0.40
codegen_flags: <defaults>
</compile_context>

<pallas_src>
import jax
import jax.numpy as jnp
from jax.experimental import pallas as pl
from jax.experimental.pallas import tpu as pltpu

LN_EPS = 1e-5
LANE = 128
SUBLANE = 8


def _round_up(n, m):
    return ((n + m - 1) // m) * m


def _layernorm_f32(h, gamma, beta):
    mu = jnp.mean(h, axis=-1, keepdims=True)
    var = jnp.mean((h - mu) ** 2, axis=-1, keepdims=True)
    return (h - mu) * jax.lax.rsqrt(var + LN_EPS) * gamma + beta


def actor_kernel(x_ref,
                 w1_ref, b1_ref, g1_ref, be1_ref,
                 w2_ref, b2_ref, g2_ref, be2_ref,
                 w3_ref, b3_ref,
                 out_ref):
    # fc1: bf16 MXU matmul, f32 accumulation -> LayerNorm -> relu (f32 VPU/EUP)
    x = x_ref[...].astype(jnp.bfloat16)
    h1 = jnp.dot(x, w1_ref[...], preferred_element_type=jnp.float32) + b1_ref[...]
    h1 = jnp.maximum(_layernorm_f32(h1, g1_ref[...], be1_ref[...]), 0.0)

    # fc2
    h2 = jnp.dot(h1.astype(jnp.bfloat16), w2_ref[...],
                 preferred_element_type=jnp.float32) + b2_ref[...]
    h2 = jnp.maximum(_layernorm_f32(h2, g2_ref[...], be2_ref[...]), 0.0)

    # mu (output lanes padded to 128 with zero columns -> lane-dense unmasked store)
    a = jnp.dot(h2.astype(jnp.bfloat16), w3_ref[...],
                preferred_element_type=jnp.float32) + b3_ref[...]
    out_ref[...] = 0.8 * jnp.tanh(a)


def actor_forward(state, params, n_actions, *, batch_tile=512):
    """state: (B, input_dims) f32; params from init_params (bf16 weights, padded mu)."""
    B, in_dims = state.shape
    fc1 = params["w1"].shape[1]
    fc2 = params["w2"].shape[1]
    na_pad = params["w3"].shape[1]  # padded to a multiple of 128 by init_params

    # Batch tile: multiple of 8 sublanes, capped by (padded) batch, sized for
    # the v7x 64 MiB VMEM / 32 MiB scoped budget at default 512 rows.
    tb = max(SUBLANE, min(_round_up(batch_tile, SUBLANE), _round_up(B, SUBLANE)))
    b_pad = _round_up(B, tb)
    state_p = jnp.pad(state, ((0, b_pad - B), (0, 0))) if b_pad != B else state

    args = (
        state_p,
        params["w1"], params["b1"], params["g1"], params["be1"],
        params["w2"], params["b2"], params["g2"], params["be2"],
        params["w3"], params["b3"],
    )

    def _nbytes(a):
        return a.size * a.dtype.itemsize

    cost = pl.CostEstimate(
        flops=2 * b_pad * (in_dims * fc1 + fc1 * fc2 + fc2 * na_pad),
        transcendentals=b_pad * (2 + na_pad),  # 2 rsqrt + padded tanh per row
        bytes_accessed=sum(_nbytes(a) for a in args) + b_pad * na_pad * 4,
    )

    def batch_map(i):
        return (i, 0)

    def const_map(i):
        return (0, 0)

    out_padded = pl.pallas_call(
        actor_kernel,
        out_shape=jax.ShapeDtypeStruct((b_pad, na_pad), jnp.float32),
        grid=(b_pad // tb,),
        in_specs=[
            pl.BlockSpec((tb, in_dims), batch_map),        # state tile
            pl.BlockSpec((in_dims, fc1), const_map),       # w1 (resident)
            pl.BlockSpec((1, fc1), const_map),             # b1
            pl.BlockSpec((1, fc1), const_map),             # gamma1
            pl.BlockSpec((1, fc1), const_map),             # beta1
            pl.BlockSpec((fc1, fc2), const_map),           # w2
            pl.BlockSpec((1, fc2), const_map),             # b2
            pl.BlockSpec((1, fc2), const_map),             # gamma2
            pl.BlockSpec((1, fc2), const_map),             # beta2
            pl.BlockSpec((fc2, na_pad), const_map),        # w3 (lane-padded)
            pl.BlockSpec((1, na_pad), const_map),          # b3 (lane-padded)
        ],
        out_specs=pl.BlockSpec((tb, na_pad), batch_map),
        compiler_params=pltpu.CompilerParams(
            dimension_semantics=("parallel",)),
        cost_estimate=cost,
    )(*args)

    return out_padded[:B, :n_actions]


def init_params(key, input_dims, fc1_dims, fc2_dims, n_actions):
    """Deterministic init matching ActorNetwork.__init__ (same distributions).

    Weights are stored as (in, out) == PyTorch weight.T, cast to bf16 for the MXU.
    The mu layer is zero-padded to a 128-wide (lane-dense) output; padded columns
    are exactly zero so they never affect the real action outputs.
    """
    ks = jax.random.split(key, 6)
    # PyTorch code uses f = 1/sqrt(weight.size()[0]) = 1/sqrt(out_features).
    f1 = 1.0 / jnp.sqrt(jnp.float32(fc1_dims))
    f2 = 1.0 / jnp.sqrt(jnp.float32(fc2_dims))
    f3 = 0.003
    na_pad = _round_up(max(n_actions, 1), LANE)

    def u(k, shape, lim):
        return jax.random.uniform(k, shape, jnp.float32, -lim, lim)

    w3 = jnp.zeros((fc2_dims, na_pad), jnp.float32)
    w3 = w3.at[:, :n_actions].set(u(ks[4], (fc2_dims, n_actions), f3))
    b3 = jnp.zeros((1, na_pad), jnp.float32)
    b3 = b3.at[:, :n_actions].set(u(ks[5], (1, n_actions), f3))

    return {
        "w1": u(ks[0], (input_dims, fc1_dims), f1).astype(jnp.bfloat16),
        "b1": u(ks[1], (1, fc1_dims), f1),
        "g1": jnp.ones((1, fc1_dims), jnp.float32),
        "be1": jnp.zeros((1, fc1_dims), jnp.float32),
        "w2": u(ks[2], (fc1_dims, fc2_dims), f2).astype(jnp.bfloat16),
        "b2": u(ks[3], (1, fc2_dims), f2),
        "g2": jnp.ones((1, fc2_dims), jnp.float32),
        "be2": jnp.zeros((1, fc2_dims), jnp.float32),
        "w3": w3.astype(jnp.bfloat16),
        "b3": b3,
    }


def reference_forward(state, params, n_actions):
    """Pure-JAX reference with the same precision policy (bf16 dots, f32 math)."""
    h = jnp.dot(state.astype(jnp.bfloat16), params["w1"],
                preferred_element_type=jnp.float32) + params["b1"]
    h = jnp.maximum(_layernorm_f32(h, params["g1"], params["be1"]), 0.0)
    h = jnp.dot(h.astype(jnp.bfloat16), params["w2"],
                preferred_element_type=jnp.float32) + params["b2"]
    h = jnp.maximum(_layernorm_f32(h, params["g2"], params["be2"]), 0.0)
    a = jnp.dot(h.astype(jnp.bfloat16), params["w3"],
                preferred_element_type=jnp.float32) + params["b3"]
    return (0.8 * jnp.tanh(a))[:, :n_actions]


if __name__ == "__main__":
    key = jax.random.PRNGKey(0)
    k_param, k_state = jax.random.split(key)

    batch = 4
    input_dims = 16
    fc1_dims = 32
    fc2_dims = 32
    n_actions = 4

    params = init_params(k_param, input_dims, fc1_dims, fc2_dims, n_actions)
    state = jax.random.normal(k_state, (batch, input_dims), jnp.float32)

    out = actor_forward(state, params, n_actions)
    out = jax.block_until_ready(out)

    ref = reference_forward(state, params, n_actions)
    assert out.shape == (batch, n_actions), out.shape
    assert jnp.all(jnp.isfinite(out)), "non-finite output"
    assert jnp.allclose(out, ref, atol=1e-3, rtol=1e-3), "mismatch vs reference"

    print("KERNEL_OK")
</pallas_src>

<mosaic_0001>
module attributes {stable_mosaic.version = 11 : i64} {
  func.func @actor_kernel(%arg0: i32, %arg1: memref<8x16xf32, #tpu.memory_space<vmem>>, %arg2: memref<16x32xbf16, #tpu.memory_space<vmem>>, %arg3: memref<1x32xf32, #tpu.memory_space<vmem>>, %arg4: memref<1x32xf32, #tpu.memory_space<vmem>>, %arg5: memref<1x32xf32, #tpu.memory_space<vmem>>, %arg6: memref<32x32xbf16, #tpu.memory_space<vmem>>, %arg7: memref<1x32xf32, #tpu.memory_space<vmem>>, %arg8: memref<1x32xf32, #tpu.memory_space<vmem>>, %arg9: memref<1x32xf32, #tpu.memory_space<vmem>>, %arg10: memref<32x128xbf16, #tpu.memory_space<vmem>>, %arg11: memref<1x128xf32, #tpu.memory_space<vmem>>, %arg12: memref<8x128xf32, #tpu.memory_space<vmem>>) attributes {dimension_semantics = [#tpu.dimension_semantics<parallel>], iteration_bounds = array<i64: 1>, scalar_prefetch = 0 : i64, scratch_operands = 0 : i64, tpu.core_type = #tpu.core_type<tc>, window_params = [{transform_indices = @transform_0, window_bounds = array<i64: 8, 16>}, {pipeline_mode = #tpu.pipeline_mode<synchronous>, transform_indices = @transform_1, window_bounds = array<i64: 16, 32>}, {pipeline_mode = #tpu.pipeline_mode<synchronous>, transform_indices = @transform_2, window_bounds = array<i64: 1, 32>}, {pipeline_mode = #tpu.pipeline_mode<synchronous>, transform_indices = @transform_3, window_bounds = array<i64: 1, 32>}, {pipeline_mode = #tpu.pipeline_mode<synchronous>, transform_indices = @transform_4, window_bounds = array<i64: 1, 32>}, {pipeline_mode = #tpu.pipeline_mode<synchronous>, transform_indices = @transform_5, window_bounds = array<i64: 32, 32>}, {pipeline_mode = #tpu.pipeline_mode<synchronous>, transform_indices = @transform_6, window_bounds = array<i64: 1, 32>}, {pipeline_mode = #tpu.pipeline_mode<synchronous>, transform_indices = @transform_7, window_bounds = array<i64: 1, 32>}, {pipeline_mode = #tpu.pipeline_mode<synchronous>, transform_indices = @transform_8, window_bounds = array<i64: 1, 32>}, {pipeline_mode = #tpu.pipeline_mode<synchronous>, transform_indices = @transform_9, window_bounds = array<i64: 32, 128>}, {pipeline_mode = #tpu.pipeline_mode<synchronous>, transform_indices = @transform_10, window_bounds = array<i64: 1, 128>}, {transform_indices = @transform_11, window_bounds = array<i64: 8, 128>}]} {
    %c0 = arith.constant 0 : index
    %c0_0 = arith.constant 0 : index
    %0 = vector.load %arg1[%c0, %c0_0] : memref<8x16xf32, #tpu.memory_space<vmem>>, vector<8x16xf32>
    %1 = arith.truncf %0 : vector<8x16xf32> to vector<8x16xbf16>
    %c0_1 = arith.constant 0 : index
    %c0_2 = arith.constant 0 : index
    %2 = vector.load %arg2[%c0_1, %c0_2] : memref<16x32xbf16, #tpu.memory_space<vmem>>, vector<16x32xbf16>
    %cst = arith.constant dense<0.000000e+00> : vector<8x32xf32>
    %3 = tpu.matmul %1, %2, %cst {dimension_numbers = #tpu.dot_dimension_numbers<[1], [0], [0], [1], [0, 0, 1, 1], [], []>} : vector<8x16xbf16>, vector<16x32xbf16>, vector<8x32xf32> -> vector<8x32xf32>
    %c0_3 = arith.constant 0 : index
    %c0_4 = arith.constant 0 : index
    %4 = vector.load %arg3[%c0_3, %c0_4] : memref<1x32xf32, #tpu.memory_space<vmem>>, vector<1x32xf32>
    %5 = vector.broadcast %4 : vector<1x32xf32> to vector<8x32xf32>
    %6 = arith.addf %3, %5 : vector<8x32xf32>
    %c0_5 = arith.constant 0 : index
    %c0_6 = arith.constant 0 : index
    %7 = vector.load %arg4[%c0_5, %c0_6] : memref<1x32xf32, #tpu.memory_space<vmem>>, vector<1x32xf32>
    %c0_7 = arith.constant 0 : index
    %c0_8 = arith.constant 0 : index
    %8 = vector.load %arg5[%c0_7, %c0_8] : memref<1x32xf32, #tpu.memory_space<vmem>>, vector<1x32xf32>
    %cst_9 = arith.constant dense<0.000000e+00> : vector<8xf32>
    %9 = vector.multi_reduction <add>, %6, %cst_9 [1] : vector<8x32xf32> to vector<8xf32>
    %10 = vector.shape_cast %9 : vector<8xf32> to vector<8x1xf32>
    %cst_10 = arith.constant 3.200000e+01 : f32
    %11 = vector.broadcast %cst_10 : f32 to vector<8x1xf32>
    %12 = arith.divf %10, %11 : vector<8x1xf32>
    %13 = vector.broadcast %12 : vector<8x1xf32> to vector<8x32xf32>
    %14 = arith.subf %6, %13 : vector<8x32xf32>
    %15 = arith.mulf %14, %14 : vector<8x32xf32>
    %cst_11 = arith.constant dense<0.000000e+00> : vector<8xf32>
    %16 = vector.multi_reduction <add>, %15, %cst_11 [1] : vector<8x32xf32> to vector<8xf32>
    %17 = vector.shape_cast %16 : vector<8xf32> to vector<8x1xf32>
    %cst_12 = arith.constant 3.200000e+01 : f32
    %18 = vector.broadcast %cst_12 : f32 to vector<8x1xf32>
    %19 = arith.divf %17, %18 : vector<8x1xf32>
    %20 = vector.broadcast %12 : vector<8x1xf32> to vector<8x32xf32>
    %21 = arith.subf %6, %20 : vector<8x32xf32>
    %cst_13 = arith.constant 9.99999974E-6 : f32
    %22 = vector.broadcast %cst_13 : f32 to vector<8x1xf32>
    %23 = arith.addf %19, %22 : vector<8x1xf32>
    %24 = math.rsqrt %23 : vector<8x1xf32>
    %25 = vector.broadcast %24 : vector<8x1xf32> to vector<8x32xf32>
    %26 = arith.mulf %21, %25 : vector<8x32xf32>
    %27 = vector.broadcast %7 : vector<1x32xf32> to vector<8x32xf32>
    %28 = arith.mulf %26, %27 : vector<8x32xf32>
    %29 = vector.broadcast %8 : vector<1x32xf32> to vector<8x32xf32>
    %30 = arith.addf %28, %29 : vector<8x32xf32>
    %cst_14 = arith.constant 0.000000e+00 : f32
    %31 = vector.broadcast %cst_14 : f32 to vector<8x32xf32>
    %32 = arith.maximumf %30, %31 : vector<8x32xf32>
    %33 = arith.truncf %32 : vector<8x32xf32> to vector<8x32xbf16>
    %c0_15 = arith.constant 0 : index
    %c0_16 = arith.constant 0 : index
    %34 = vector.load %arg6[%c0_15, %c0_16] : memref<32x32xbf16, #tpu.memory_space<vmem>>, vector<32x32xbf16>
    %cst_17 = arith.constant dense<0.000000e+00> : vector<8x32xf32>
    %35 = tpu.matmul %33, %34, %cst_17 {dimension_numbers = #tpu.dot_dimension_numbers<[1], [0], [0], [1], [0, 0, 1, 1], [], []>} : vector<8x32xbf16>, vector<32x32xbf16>, vector<8x32xf32> -> vector<8x32xf32>
    %c0_18 = arith.constant 0 : index
    %c0_19 = arith.constant 0 : index
    %36 = vector.load %arg7[%c0_18, %c0_19] : memref<1x32xf32, #tpu.memory_space<vmem>>, vector<1x32xf32>
    %37 = vector.broadcast %36 : vector<1x32xf32> to vector<8x32xf32>
    %38 = arith.addf %35, %37 : vector<8x32xf32>
    %c0_20 = arith.constant 0 : index
    %c0_21 = arith.constant 0 : index
    %39 = vector.load %arg8[%c0_20, %c0_21] : memref<1x32xf32, #tpu.memory_space<vmem>>, vector<1x32xf32>
    %c0_22 = arith.constant 0 : index
    %c0_23 = arith.constant 0 : index
    %40 = vector.load %arg9[%c0_22, %c0_23] : memref<1x32xf32, #tpu.memory_space<vmem>>, vector<1x32xf32>
    %cst_24 = arith.constant dense<0.000000e+00> : vector<8xf32>
    %41 = vector.multi_reduction <add>, %38, %cst_24 [1] : vector<8x32xf32> to vector<8xf32>
    %42 = vector.shape_cast %41 : vector<8xf32> to vector<8x1xf32>
    %cst_25 = arith.constant 3.200000e+01 : f32
    %43 = vector.broadcast %cst_25 : f32 to vector<8x1xf32>
    %44 = arith.divf %42, %43 : vector<8x1xf32>
    %45 = vector.broadcast %44 : vector<8x1xf32> to vector<8x32xf32>
    %46 = arith.subf %38, %45 : vector<8x32xf32>
    %47 = arith.mulf %46, %46 : vector<8x32xf32>
    %cst_26 = arith.constant dense<0.000000e+00> : vector<8xf32>
    %48 = vector.multi_reduction <add>, %47, %cst_26 [1] : vector<8x32xf32> to vector<8xf32>
    %49 = vector.shape_cast %48 : vector<8xf32> to vector<8x1xf32>
    %cst_27 = arith.constant 3.200000e+01 : f32
    %50 = vector.broadcast %cst_27 : f32 to vector<8x1xf32>
    %51 = arith.divf %49, %50 : vector<8x1xf32>
    %52 = vector.broadcast %44 : vector<8x1xf32> to vector<8x32xf32>
    %53 = arith.subf %38, %52 : vector<8x32xf32>
    %cst_28 = arith.constant 9.99999974E-6 : f32
    %54 = vector.broadcast %cst_28 : f32 to vector<8x1xf32>
    %55 = arith.addf %51, %54 : vector<8x1xf32>
    %56 = math.rsqrt %55 : vector<8x1xf32>
    %57 = vector.broadcast %56 : vector<8x1xf32> to vector<8x32xf32>
    %58 = arith.mulf %53, %57 : vector<8x32xf32>
    %59 = vector.broadcast %39 : vector<1x32xf32> to vector<8x32xf32>
    %60 = arith.mulf %58, %59 : vector<8x32xf32>
    %61 = vector.broadcast %40 : vector<1x32xf32> to vector<8x32xf32>
    %62 = arith.addf %60, %61 : vector<8x32xf32>
    %cst_29 = arith.constant 0.000000e+00 : f32
    %63 = vector.broadcast %cst_29 : f32 to vector<8x32xf32>
    %64 = arith.maximumf %62, %63 : vector<8x32xf32>
    %65 = arith.truncf %64 : vector<8x32xf32> to vector<8x32xbf16>
    %c0_30 = arith.constant 0 : index
    %c0_31 = arith.constant 0 : index
    %66 = vector.load %arg10[%c0_30, %c0_31] : memref<32x128xbf16, #tpu.memory_space<vmem>>, vector<32x128xbf16>
    %cst_32 = arith.constant dense<0.000000e+00> : vector<8x128xf32>
    %67 = tpu.matmul %65, %66, %cst_32 {dimension_numbers = #tpu.dot_dimension_numbers<[1], [0], [0], [1], [0, 0, 1, 1], [], []>} : vector<8x32xbf16>, vector<32x128xbf16>, vector<8x128xf32> -> vector<8x128xf32>
    %c0_33 = arith.constant 0 : index
    %c0_34 = arith.constant 0 : index
    %68 = vector.load %arg11[%c0_33, %c0_34] : memref<1x128xf32, #tpu.memory_space<vmem>>, vector<1x128xf32>
    %69 = vector.broadcast %68 : vector<1x128xf32> to vector<8x128xf32>
    %70 = arith.addf %67, %69 : vector<8x128xf32>
    %71 = math.tanh %70 : vector<8x128xf32>
    %cst_35 = arith.constant 8.000000e-01 : f32
    %72 = vector.broadcast %cst_35 : f32 to vector<8x128xf32>
    %73 = arith.mulf %72, %71 : vector<8x128xf32>
    %c0_36 = arith.constant 0 : index
    %c0_37 = arith.constant 0 : index
    %74 = vector.load %arg12[%c0_36, %c0_37] : memref<8x128xf32, #tpu.memory_space<vmem>>, vector<8x128xf32>
    tpu.vector_store %arg12[%c0_36, %c0_37], %73 {strides = array<i32>} : memref<8x128xf32, #tpu.memory_space<vmem>>, vector<8x128xf32>,
    return
  }
  func.func @transform_0(%arg0: i32) -> (i32, i32) {
    %c0_i32 = arith.constant 0 : i32
    %c0_i32_0 = arith.constant 0 : i32
    return %arg0, %c0_i32 : i32, i32
  }
  func.func @transform_1(%arg0: i32) -> (i32, i32) {
    %c0_i32 = arith.constant 0 : i32
    %c0_i32_0 = arith.constant 0 : i32
    %c0_i32_1 = arith.constant 0 : i32
    return %c0_i32, %c0_i32_0 : i32, i32
  }
  func.func @transform_2(%arg0: i32) -> (i32, i32) {
    %c0_i32 = arith.constant 0 : i32
    %c0_i32_0 = arith.constant 0 : i32
    %c0_i32_1 = arith.constant 0 : i32
    return %c0_i32, %c0_i32_0 : i32, i32
  }
  func.func @transform_3(%arg0: i32) -> (i32, i32) {
    %c0_i32 = arith.constant 0 : i32
    %c0_i32_0 = arith.constant 0 : i32
    %c0_i32_1 = arith.constant 0 : i32
    return %c0_i32, %c0_i32_0 : i32, i32
  }
  func.func @transform_4(%arg0: i32) -> (i32, i32) {
    %c0_i32 = arith.constant 0 : i32
    %c0_i32_0 = arith.constant 0 : i32
    %c0_i32_1 = arith.constant 0 : i32
    return %c0_i32, %c0_i32_0 : i32, i32
  }
  func.func @transform_5(%arg0: i32) -> (i32, i32) {
    %c0_i32 = arith.constant 0 : i32
    %c0_i32_0 = arith.constant 0 : i32
    %c0_i32_1 = arith.constant 0 : i32
    return %c0_i32, %c0_i32_0 : i32, i32
  }
  func.func @transform_6(%arg0: i32) -> (i32, i32) {
    %c0_i32 = arith.constant 0 : i32
    %c0_i32_0 = arith.constant 0 : i32
    %c0_i32_1 = arith.constant 0 : i32
    return %c0_i32, %c0_i32_0 : i32, i32
  }
  func.func @transform_7(%arg0: i32) -> (i32, i32) {
    %c0_i32 = arith.constant 0 : i32
    %c0_i32_0 = arith.constant 0 : i32
    %c0_i32_1 = arith.constant 0 : i32
    return %c0_i32, %c0_i32_0 : i32, i32
  }
  func.func @transform_8(%arg0: i32) -> (i32, i32) {
    %c0_i32 = arith.constant 0 : i32
    %c0_i32_0 = arith.constant 0 : i32
    %c0_i32_1 = arith.constant 0 : i32
    return %c0_i32, %c0_i32_0 : i32, i32
  }
  func.func @transform_9(%arg0: i32) -> (i32, i32) {
    %c0_i32 = arith.constant 0 : i32
    %c0_i32_0 = arith.constant 0 : i32
    %c0_i32_1 = arith.constant 0 : i32
    return %c0_i32, %c0_i32_0 : i32, i32
  }
  func.func @transform_10(%arg0: i32) -> (i32, i32) {
    %c0_i32 = arith.constant 0 : i32
    %c0_i32_0 = arith.constant 0 : i32
    %c0_i32_1 = arith.constant 0 : i32
    return %c0_i32, %c0_i32_0 : i32, i32
  }
  func.func @transform_11(%arg0: i32) -> (i32, i32) {
    %c0_i32 = arith.constant 0 : i32
    %c0_i32_0 = arith.constant 0 : i32
    return %arg0, %c0_i32 : i32, i32
  }
}

</mosaic_0001>

<bundles_post_ra>
// kernel: tpu_custom_call.1
= control target key start
LH: loop header
LB: loop body
LE: loop exit
PB: predicated region body
PF: predicated region fallthrough
CT: control target
= control target key end

     0   :  { %16 = vsyncpa [#allocation3], 0  ;;  %s811_s0 = inlined_call_operand.hbm [shape: f32[8,16], index: 0, kind: input, shape index: {}]   ;;  %s812_s1 = inlined_call_operand.hbm [shape: bf16[16,32], index: 1, kind: input, shape index: {}]   ;;  %s813_s2 = inlined_call_operand.vmem [shape: f32[1,32], index: 2, kind: input, shape index: {}]   ;;  %s814_s3 = inlined_call_operand.vmem [shape: f32[1,32], index: 3, kind: input, shape index: {}]   ;;  %s815_s4 = inlined_call_operand.hbm [shape: f32[1,32], index: 4, kind: input, shape index: {}]   ;;  %s816_s5 = inlined_call_operand.vmem [shape: bf16[32,32], index: 5, kind: input, shape index: {}]   ;;  %s817_s6 = inlined_call_operand.hbm [shape: f32[1,32], index: 6, kind: input, shape index: {}]   ;;  %s818_s7 = inlined_call_operand.hbm [shape: f32[1,32], index: 7, kind: input, shape index: {}]   ;;  %s819_s8 = inlined_call_operand.hbm [shape: f32[1,32], index: 8, kind: input, shape index: {}]   ;;  %s820_s9 = inlined_call_operand.vmem [shape: bf16[32,128], index: 9, kind: input, shape index: {}]   ;;  %s821_s10 = inlined_call_operand.vmem [shape: f32[1,128], index: 10, kind: input, shape index: {}]   ;;  %s822_s11 = inlined_call_operand.hbm [shape: f32[8,128], index: 11, kind: output, shape index: {}]  }
   0x1   :  { %17 = vsyncpa [#allocation6], 0 }
   0x2   :  { %18 = vsyncpa [#allocation9], 0 }
   0x3   :  { %19 = vsyncpa [#allocation12], 0 }
   0x4   :  { %20 = vsyncpa [#allocation4], 0  ;;  %s621_s17 = smov [#allocation5]   ;;  %s457_s21 = scalar_lea.hbm %s812_s1, 128 }
   0x5   :  { %s36_s18 = sshll.u32 %s621_s17, 4  ;;  %p458_p0 = scmp.ne.s32.totalorder %s812_s1, %s457_s21  ;;  %s37_s18 = int_to_ptr.vmem [resolvable:$true] %s36_s18 }
   0x6   :  { %p461_p1 = scmp.lt.u32.totalorder %s457_s21, %s812_s1 }
   0x8   :  { %p463_p2 = pnand %p461_p1, %p458_p0 }
   0xa   :  { %466 = shalt.err (!%p463_p2)
}
   0xb   :  { %s467_s26 = scalar_lea.vmem %s37_s18, 128  ;;  %p472_p4 = scmp.lt.s32.totalorder %s37_s18, %s37_s18 }
   0xc   :  { %p468_p3 = scmp.ne.s32.totalorder %s37_s18, %s467_s26  ;;  %p473_p5 = scmp.lt.s32.totalorder %s467_s26, %s467_s26 }
   0xe   :  { %p474_p6 = por %p473_p5, %p472_p4 }
  0x10   :  { %p475_p7 = pnand %p474_p6, %p468_p3 }
  0x12   :  { %478 = shalt.err (!%p475_p7)
}
  0x13   :  { %s622_s27 = smov 64   ;;  %s623_s28 = smov 4  }
  0x14   :  { %42 = dma.hbm_to_vmem [thread:$0]  %s812_s1, 128, %s37_s18, [#allocation6], %s622_s27, %s622_s27, %s623_s28  }
  0x15   :  { %s624_s12 = smov [#allocation8]   ;;  %s625_s14 = smov [#allocation2]  }
  0x16   :  { %s65_s13 = sshll.u32 %s624_s12, 4  ;;  %s27_s15 = sshll.u32 %s625_s14, 4  ;;  %s66_s13 = int_to_ptr.vmem [resolvable:$true] %s65_s13  ;;  %s28_s15 = int_to_ptr.vmem [resolvable:$true] %s27_s15 }
  0x17   :  { %s479_s19 = scalar_lea.hbm %s817_s6, 16 }
  0x18   :  { %p480_p8 = scmp.ne.s32.totalorder %s817_s6, %s479_s19  ;;  %p483_p9 = scmp.lt.u32.totalorder %s479_s19, %s817_s6 }
  0x1a   :  { %p485_p10 = pnand %p483_p9, %p480_p8 }
  0x1c   :  { %488 = shalt.err (!%p485_p10)
}
  0x1d   :  { %s489_s1 = scalar_lea.vmem %s66_s13, 16  ;;  %s493_s18 = scalar_lea.vmem %s66_s13, 32 }
  0x1e   :  { %p490_p11 = scmp.ne.s32.totalorder %s66_s13, %s489_s1  ;;  %p494_p12 = scmp.lt.s32.totalorder %s66_s13, %s66_s13 }
  0x1f   :  { %p495_p13 = scmp.lt.s32.totalorder %s493_s18, %s489_s1 }
  0x21   :  { %p496_p0 = por %p495_p13, %p494_p12 }
  0x23   :  { %p497_p1 = pnand %p496_p0, %p490_p11 }
  0x25   :  { %500 = shalt.err (!%p497_p1)
}
  0x26   :  { %68 = dma.hbm_to_vmem [thread:$0]  %s817_s6, 16, %s66_s13, [#allocation9]  }
  0x27   :  { %s501_s28 = scalar_lea.hbm %s811_s0, 128 }
  0x28   :  { %p502_p2 = scmp.ne.s32.totalorder %s811_s0, %s501_s28  ;;  %p505_p3 = scmp.lt.u32.totalorder %s501_s28, %s811_s0 }
  0x2a   :  { %p507_p4 = pnand %p505_p3, %p502_p2 }
  0x2c   :  { %510 = shalt.err (!%p507_p4)
}
  0x2d   :  { %s511_s16 = scalar_lea.vmem %s28_s15, 128  ;;  %p516_p6 = scmp.lt.s32.totalorder %s28_s15, %s28_s15 }
  0x2e   :  { %p512_p5 = scmp.ne.s32.totalorder %s28_s15, %s511_s16  ;;  %p517_p7 = scmp.lt.s32.totalorder %s511_s16, %s511_s16 }
  0x30   :  { %p518_p8 = por %p517_p7, %p516_p6 }
  0x32   :  { %p519_p9 = pnand %p518_p8, %p512_p5 }
  0x34   :  { %522 = shalt.err (!%p519_p9)
}
  0x35   :  { %30 = dma.hbm_to_vmem [thread:$0]  %s811_s0, 128, %s28_s15, [#allocation3]  }
  0x36   :  { %s626_s17 = smov [#allocation7]   ;;  %s627_s20 = smov [#allocation10]  }
  0x37   :  { %s53_s19 = sshll.u32 %s626_s17, 4  ;;  %s75_s21 = sshll.u32 %s627_s20, 4  ;;  %s54_s19 = int_to_ptr.vmem [resolvable:$true] %s53_s19  ;;  %s76_s21 = int_to_ptr.vmem [resolvable:$true] %s75_s21 }
  0x38   :  { %s523_s1 = scalar_lea.hbm %s815_s4, 16 }
  0x39   :  { %p524_p10 = scmp.ne.s32.totalorder %s815_s4, %s523_s1  ;;  %p527_p11 = scmp.lt.u32.totalorder %s523_s1, %s815_s4 }
  0x3b   :  { %p529_p12 = pnand %p527_p11, %p524_p10 }
  0x3d   :  { %532 = shalt.err (!%p529_p12)
}
  0x3e   :  { %s533_s0 = scalar_lea.vmem %s54_s19, 16  ;;  %s537_s15 = scalar_lea.vmem %s54_s19, 32 }
  0x3f   :  { %p534_p13 = scmp.ne.s32.totalorder %s54_s19, %s533_s0  ;;  %p538_p0 = scmp.lt.s32.totalorder %s54_s19, %s54_s19 }
  0x40   :  { %p539_p1 = scmp.lt.s32.totalorder %s537_s15, %s533_s0 }
  0x42   :  { %p540_p2 = por %p539_p1, %p538_p0 }
  0x44   :  { %p541_p3 = pnand %p540_p2, %p534_p13 }
  0x46   :  { %544 = shalt.err (!%p541_p3)
}
  0x47   :  { %56 = dma.hbm_to_vmem [thread:$0]  %s815_s4, 16, %s54_s19, [#allocation6]  }
  0x48   :  { %s545_s12 = scalar_lea.hbm %s818_s7, 16 }
  0x49   :  { %p546_p4 = scmp.ne.s32.totalorder %s818_s7, %s545_s12  ;;  %p549_p5 = scmp.lt.u32.totalorder %s545_s12, %s818_s7 }
  0x4b   :  { %p551_p6 = pnand %p549_p5, %p546_p4 }
  0x4d   :  { %554 = shalt.err (!%p551_p6)
}
  0x4e   :  { %s555_s17 = scalar_lea.vmem %s76_s21, 16  ;;  %s559_s20 = scalar_lea.vmem %s76_s21, 32 }
  0x4f   :  { %p556_p7 = scmp.ne.s32.totalorder %s76_s21, %s555_s17  ;;  %p560_p8 = scmp.lt.s32.totalorder %s76_s21, %s76_s21 }
  0x50   :  { %p561_p9 = scmp.lt.s32.totalorder %s559_s20, %s555_s17 }
  0x52   :  { %p562_p10 = por %p561_p9, %p560_p8 }
  0x54   :  { %p563_p11 = pnand %p562_p10, %p556_p7 }
  0x56   :  { %566 = shalt.err (!%p563_p11)
}
  0x57   :  { %78 = dma.hbm_to_vmem [thread:$0]  %s818_s7, 16, %s76_s21, [#allocation9]  }
  0x58   :  { %s628_s22 = smov [#allocation11]   ;;  %s567_s24 = scalar_lea.hbm %s819_s8, 16 }
  0x59   :  { %s85_s23 = sshll.u32 %s628_s22, 4  ;;  %p568_p12 = scmp.ne.s32.totalorder %s819_s8, %s567_s24  ;;  %s86_s23 = int_to_ptr.vmem [resolvable:$true] %s85_s23 }
  0x5a   :  { %p571_p13 = scmp.lt.u32.totalorder %s567_s24, %s819_s8 }
  0x5c   :  { %p573_p0 = pnand %p571_p13, %p568_p12 }
  0x5e   :  { %576 = shalt.err (!%p573_p0)
}
  0x5f   :  { %s577_s27 = scalar_lea.vmem %s86_s23, 16  ;;  %s581_s7 = scalar_lea.vmem %s86_s23, 32 }
  0x60   :  { %p578_p1 = scmp.ne.s32.totalorder %s86_s23, %s577_s27  ;;  %p582_p2 = scmp.lt.s32.totalorder %s86_s23, %s86_s23 }
  0x61   :  { %p583_p3 = scmp.lt.s32.totalorder %s581_s7, %s577_s27 }
  0x63   :  { %p584_p4 = por %p583_p3, %p582_p2 }
  0x65   :  { %p585_p5 = pnand %p584_p4, %p578_p1 }
  0x67   :  { %588 = shalt.err (!%p585_p5)
}
  0x68   :  { %88 = dma.hbm_to_vmem [thread:$0]  %s819_s8, 16, %s86_s23, [#allocation12]  }
  0x69   :  { %611 = dma.done.wait [#allocation3], 128  }
  0x6a   :  { %612 = vsyncadd [#allocation3], 4294967168 }
  0x6b   :  { %613 = dma.done.wait [#allocation6], 144  }
  0x6c   :  { %614 = vsyncadd [#allocation6], 4294967152 }
  0x6d   :  { %615 = dma.done.wait [#allocation9], 32  }
  0x6e   :  { %616 = vsyncadd [#allocation9], 4294967264 }
  0x6f   :  { %617 = dma.done.wait [#allocation12], 16  }
  0x70   :  { %618 = vsyncadd [#allocation12], 4294967280  ;;  %v629_v0 = vmov 0.0   ;;  %vm630_vm0 = vmmov 0   ;;  %v446_v1 = vld [vmem:[#allocation5] sm:$0xff]   ;;  %v112_v2 = vld [vmem:[#allocation2] sm:$0xff] }
  0x71   :  { %413 = vmatprep.subr.bf16.mxu0 %v629_v0  ;;  %415 = vmatprep.mubr.msk.bf16.mxu0 %vm630_vm0, %v629_v0  ;;  %vm129_vm1 = vcmask 130048   ;;  %v113_v3 = vpack.c.bf16 %v112_v2, %v112_v2  ;;  %v390_v4 = vld [vmem:[%s813_s2] ss:$0 sm:$0xff]  ;;  %vm175_vm2 = vcmask 261120   ;;  %v448_v17 = vld [vmem:[%s816_s5 + $0x8] sm:$0xff]  }
  0x72   :  { %419 = vmatprep.subr.bf16.mxu1 %v629_v0  ;;  %423 = vmatprep.mubr.msk.bf16.mxu1 %vm630_vm0, %v629_v0  ;;  %v447_v16 = vld [vmem:[%s816_s5] sm:$0xff]   ;;  %v394_v24 = vld [vmem:[#allocation7] ss:$0 sm:$0xff]  ;;  %v395_v29 = vld [vmem:[#allocation8] ss:$0 sm:$0xff] }
  0x73   :  { %414 = vmatpush3.bf16.msra.mxu0 %v446_v1  ;;  %420 = vmatpush3.bf16.msra.mxu1 %v447_v16  ;;  %v393_v22 = vld [vmem:[%s814_s3] ss:$0 sm:$0xff]  ;;  %v450_v42 = vld [vmem:[%s820_s9 + $0x8] sm:$0xff]   ;;  %v399_v47 = vld [vmem:[#allocation10] ss:$0 sm:$0xff] }
  0x74   :  { %427 = vmatprep.subr.bf16.mxu0 %v629_v0  ;;  %421 = vmatprep.subr.bf16.mxu1 %v629_v0  ;;  %v449_v41 = vld [vmem:[%s820_s9] sm:$0xff]   ;;  %v400_v49 = vld [vmem:[#allocation11] ss:$0 sm:$0xff]  ;;  %s631_s9 = smov [#allocation13]  }
  0x75   :  { %v401_v54 = vld [vmem:[%s821_s10] ss:$0 sm:$0xff]  ;;  %s378_s19 = sshll.u32 %s631_s9, 4  ;;  %s379_s19 = int_to_ptr.vmem [resolvable:$true] %s378_s19 }
  0x76   :  { %416 = vmatmul.mubr.msk.bf16.vlgmr.msra.gmra.mrb[0].mxu0 %vm129_vm1, %v113_v3  ;;  %s589_s22 = scalar_lea.vmem %s379_s19, 128  ;;  %p594_p7 = scmp.lt.s32.totalorder %s379_s19, %s379_s19 }
  0x77   :  { %431 = vmatprep.mubr.msk.bf16.mxu0 %vm630_vm0, %v629_v0  ;;  %422 = vmatpush3.bf16.msra.mxu1 %v448_v17  ;;  %p590_p6 = scmp.ne.s32.totalorder %s379_s19, %s589_s22  ;;  %p595_p8 = scmp.lt.s32.totalorder %s589_s22, %s589_s22 }
  0x78   :  { %428 = vmatpush3.bf16.msra.mxu0 %v449_v41 }
  0x79   :  { %429 = vmatprep.subr.bf16.mxu0 %v629_v0  ;;  %p596_p9 = por %p595_p8, %p594_p7 }
  0x7b   :  { %p597_p10 = pnand %p596_p9, %p590_p6 }
  0x7c   :  { %430 = vmatpush3.bf16.msra.mxu0 %v450_v42 }
 0x149   :  { %v167_v5 = vpop.f32.mrb[0].mxu0 }
 0x14a   :  { %v168_v6 = vadd.f32 %v390_v4, %v167_v5  ;;  %v417_v7 = vpop.f32.mrb[1].mxu0 }
 0x14b   :  { %v170_v8 = vpop.f32.mrb[2].mxu0 }
 0x14c   :  { %v418_v9 = vpop.f32.mrb[3].mxu0  ;;  %v176_v10 = vsel %vm175_vm2, %v168_v6, 0.0 }
 0x14d   :  { %177 = vadd.xlane.f32.xlu0 %v176_v10 }
 0x1da   :  { %v178_v11 = vpop.xlane.xlu0 %177 }
 0x1db   :  { %v180_v12 = vmul.f32 0.03125, %v178_v11 }
 0x1dd   :  { %v181_v13 = vsub.f32 %v168_v6, %v180_v12 }
 0x1df   :  { %v182_v14 = vmul.f32 %v181_v13, %v181_v13 }
 0x1e1   :  { %v183_v15 = vsel %vm175_vm2, %v182_v14, 0.0 }
 0x1e2   :  { %184 = vadd.xlane.f32.xlu0 %v183_v15 }
 0x26f   :  { %v185_v18 = vpop.xlane.xlu0 %184 }
 0x270   :  { %v186_v19 = vmul.f32 0.03125, %v185_v18 }
 0x272   :  { %v187_v20 = vadd.f32 1e-05, %v186_v19 }
 0x274   :  { %451 = vrsqrt.f32 %v187_v20 }
 0x27e   :  { %v452_v21 = vpop.eup %451 }
 0x27f   :  { %v189_v23 = vmul.f32 %v452_v21, %v181_v13 }
 0x281   :  { %v196_v25 = vmul.f32 %v393_v22, %v189_v23 }
 0x283   :  { %v203_v26 = vadd.f32 %v394_v24, %v196_v25 }
 0x285   :  { %v204_v27 = vmax.f32 %v203_v26, 0.0 }
 0x287   :  { %v205_v28 = vpack.c.bf16 %v204_v27, %v204_v27 }
 0x289   :  { %424 = vmatmul.mubr.msk.bf16.vlgmr.msra.gmra.mrb[0].mxu1 %vm175_vm2, %v205_v28 }
 0x35c   :  { %v266_v30 = vpop.f32.mrb[0].mxu1 }
 0x35d   :  { %v267_v31 = vadd.f32 %v395_v29, %v266_v30  ;;  %v425_v32 = vpop.f32.mrb[1].mxu1 }
 0x35e   :  { %v269_v33 = vpop.f32.mrb[2].mxu1 }
 0x35f   :  { %v426_v34 = vpop.f32.mrb[3].mxu1  ;;  %v274_v35 = vsel %vm175_vm2, %v267_v31, 0.0 }
 0x360   :  { %275 = vadd.xlane.f32.xlu1 %v274_v35 }
 0x3ed   :  { %v276_v36 = vpop.xlane.xlu1 %275 }
 0x3ee   :  { %v277_v37 = vmul.f32 0.03125, %v276_v36 }
 0x3f0   :  { %v278_v38 = vsub.f32 %v267_v31, %v277_v37 }
 0x3f2   :  { %v279_v39 = vmul.f32 %v278_v38, %v278_v38 }
 0x3f4   :  { %v280_v40 = vsel %vm175_vm2, %v279_v39, 0.0 }
 0x3f5   :  { %281 = vadd.xlane.f32.xlu1 %v280_v40 }
 0x482   :  { %v282_v43 = vpop.xlane.xlu1 %281 }
 0x483   :  { %v283_v44 = vmul.f32 0.03125, %v282_v43 }
 0x485   :  { %v284_v45 = vadd.f32 1e-05, %v283_v44 }
 0x487   :  { %453 = vrsqrt.f32 %v284_v45 }
 0x491   :  { %v454_v46 = vpop.eup %453 }
 0x492   :  { %v286_v48 = vmul.f32 %v454_v46, %v278_v38 }
 0x494   :  { %v293_v50 = vmul.f32 %v399_v47, %v286_v48 }
 0x496   :  { %v300_v51 = vadd.f32 %v400_v49, %v293_v50 }
 0x498   :  { %v301_v52 = vmax.f32 %v300_v51, 0.0 }
 0x49a   :  { %v302_v53 = vpack.c.bf16 %v301_v52, %v301_v52 }
 0x49c   :  { %432 = vmatmul.mubr.msk.bf16.vlgmr.msra.gmra.mrb[4].mxu0 %vm175_vm2, %v302_v53 }
 0x56f   :  { %v363_v55 = vpop.f32.mrb[4].mxu0 }
 0x570   :  { %v364_v56 = vadd.f32 %v401_v54, %v363_v55  ;;  %v433_v57 = vpop.f32.mrb[5].mxu0 }
 0x571   :  { %v366_v58 = vpop.f32.mrb[6].mxu0 }
 0x572   :  { %455 = vtanh.f32 %v364_v56  ;;  %v434_v59 = vpop.f32.mrb[7].mxu0 }
 0x57c   :  { %v456_v60 = vpop.eup %455 }
 0x57d   :  { %v370_v61 = vmul.f32 0.8, %v456_v60 }
 0x57f   :  { %371 = vst [vmem:[#allocation13] sm:$0xff] %v370_v61 }
 0x580   :  { %600 = shalt.err (!%p597_p10)
}
 0x581   :  { %s601_s1 = scalar_lea.hbm %s822_s11, 128 }
 0x582   :  { %p602_p11 = scmp.ne.s32.totalorder %s822_s11, %s601_s1  ;;  %p605_p12 = scmp.lt.u32.totalorder %s601_s1, %s822_s11 }
 0x584   :  { %p607_p13 = pnand %p605_p12, %p602_p11 }
 0x586   :  { %610 = shalt.err (!%p607_p13)
}
 0x587   :  { %381 = dma.vmem_to_hbm [thread:$0]  %s379_s19, 128, %s822_s11, [#allocation4]  }
 0x588   :  { %619 = dma.done.wait [#allocation4], 128  }
 0x589   :  { %620 = vsyncadd [#allocation4], 4294967168 }
 0x58a   :  { %385 = vsyncpa [#allocation3], 1 }
 0x58b   :  { %386 = vsyncpa [#allocation6], 1 }
 0x58c   :  { %387 = vsyncpa [#allocation9], 1 }
 0x58d   :  { %388 = vsyncpa [#allocation12], 1 }
 0x58e   :  { %389 = vsyncpa [#allocation4], 1 }

</bundles_post_ra>
